<compile_context>
chip_gen: v6e
topology: v6e:2x2x1
jax: 0.10.0
libtpu: 0.0.40
codegen_flags: <defaults>
</compile_context>

<pallas_src>
import jax
import jax.numpy as jnp
from jax.experimental import pallas as pl
from jax.experimental.pallas import tpu as pltpu

NEG_SLOPE = 0.01  # F.leaky_relu default
LANE = 128
SUBLANE = 8


def _round_up(x, m):
    return (x + m - 1) // m * m


def _cdiv(a, b):
    return (a + b - 1) // b


def _leaky_relu(x):
    return jnp.where(x > 0, x, NEG_SLOPE * x)


def policy_kernel(x_ref, w1_ref, b1_ref, w2_ref, b2_ref, w3_ref, b3_ref, o_ref):
    """One batch tile: softmax(lrelu(lrelu(x@W1+b1)@W2+b2)@W3+b3, axis=1)."""
    x = x_ref[...]  # (TB, S) f32

    # l1 + leaky_relu  (padded hidden lanes: 0*x + 0 bias -> 0 -> stays 0)
    h = jnp.dot(x, w1_ref[...], preferred_element_type=jnp.float32) + b1_ref[...]
    h = _leaky_relu(h)

    # l2 + leaky_relu
    h = jnp.dot(h, w2_ref[...], preferred_element_type=jnp.float32) + b2_ref[...]
    h = _leaky_relu(h)

    # l3 logits. Padded action lanes of b3 hold -1e30 (padded W3 columns are 0),
    # so padded logits are exactly -1e30 — no in-kernel mask needed.
    logits = jnp.dot(h, w3_ref[...], preferred_element_type=jnp.float32) + b3_ref[...]

    # Numerically stable row softmax; divide goes to the EUP (approx recip)
    # with one Newton-Raphson refinement to restore f32 accuracy.
    m = jnp.max(logits, axis=1, keepdims=True)
    e = jnp.exp(logits - m)
    denom = jnp.sum(e, axis=1, keepdims=True)
    inv = pl.reciprocal(denom, approx=True)
    inv = inv * (2.0 - denom * inv)  # Newton step on a (TB,1) vector (cheap)
    o_ref[...] = (e * inv).astype(o_ref.dtype)


def pad_params(params):
    """Pad torch-layout params to lane-dense (multiple-of-128) feature dims.

    The softmax mask is baked into b3: padded action lanes get -1e30.
    """
    w1, b1, w2, b2, w3, b3 = params
    S, H = w1.shape
    A = w3.shape[1]
    Hp = _round_up(H, LANE)
    Ap = _round_up(A, LANE)

    def pad2(a, rows, cols, cval=0.0):
        return jnp.pad(a, ((0, rows - a.shape[0]), (0, cols - a.shape[1])),
                       constant_values=cval)

    return (
        pad2(w1, S, Hp), pad2(b1, 1, Hp),
        pad2(w2, Hp, Hp), pad2(b2, 1, Hp),
        pad2(w3, Hp, Ap),
        pad2(b3, 1, Ap, cval=-1e30),   # mask for padded action lanes
    )


def _default_block_b():
    """Batch-tile default tuned per TPU generation (kernel is overhead/mem bound)."""
    try:
        kind = jax.devices()[0].device_kind.lower()
    except Exception:
        return 4096
    if "v5 lite" in kind or "v5e" in kind or "v5lite" in kind:
        return 2048
    if "v6" in kind:
        return 4096
    if "v7" in kind:
        return 8192
    return 4096


def policy_forward(state, padded_params, action_dim, *, block_b=None,
                   out_dtype=jnp.float32, min_grid_steps=4):
    """state: (B, state_dim) f32 -> (B, action_dim) softmax probabilities."""
    w1, b1, w2, b2, w3, b3 = padded_params
    B, S = state.shape
    Hp = w1.shape[1]
    Ap = w3.shape[1]

    if block_b is None:
        block_b = _default_block_b()

    # Batch tile: large enough to amortize the ~0.35us/step grid overhead,
    # capped so the grid keeps >= min_grid_steps steps (lets ("parallel",)
    # shard tiles across v7x's two TensorCores and keeps input/output DMA
    # double-buffering busy). Always a multiple of 8 sublanes.
    tb_cap = _round_up(max(_cdiv(B, min_grid_steps), SUBLANE), SUBLANE)
    TB = max(SUBLANE, min(_round_up(block_b, SUBLANE), tb_cap))
    Bp = _round_up(B, TB)
    if Bp != B:
        state = jnp.pad(state, ((0, Bp - B), (0, 0)))

    grid = (Bp // TB,)

    # Weights/biases: full blocks, constant index_maps -> VMEM-resident across
    # all grid steps (~132 KB), never re-DMA'd.
    full = lambda shp: pl.BlockSpec(shp, lambda i: (0,) * len(shp))

    itemsize = 4  # f32
    param_bytes = sum(int(p.size) * itemsize for p in padded_params)
    io_bytes_per_row = (S + Ap) * itemsize
    cost = pl.CostEstimate(
        flops=2 * Bp * (S * Hp + Hp * Hp + Hp * Ap),
        transcendentals=Bp * (Ap + 1),
        bytes_accessed=Bp * io_bytes_per_row + param_bytes,
    )

    # Double-buffered x/out tiles + resident params + headroom; well inside
    # v7x's 64 MiB physical VMEM even at TB=8192.
    vmem_needed = 2 * TB * io_bytes_per_row + param_bytes + (4 << 20)
    vmem_limit = int(min(56 << 20, max(32 << 20, vmem_needed)))

    out = pl.pallas_call(
        policy_kernel,
        out_shape=jax.ShapeDtypeStruct((Bp, Ap), out_dtype),
        grid=grid,
        in_specs=[
            # (TB, S) is legal because S equals the full array dim.
            pl.BlockSpec((TB, S), lambda i: (i, 0)),
            full(w1.shape), full(b1.shape),
            full(w2.shape), full(b2.shape),
            full(w3.shape), full(b3.shape),
        ],
        out_specs=pl.BlockSpec((TB, Ap), lambda i: (i, 0)),  # lane-dense stores
        compiler_params=pltpu.CompilerParams(
            dimension_semantics=("parallel",),  # shard batch tiles across TCs
            vmem_limit_bytes=vmem_limit,
        ),
        cost_estimate=cost,
    )(state, w1, b1, w2, b2, w3, b3)

    # Slice off batch padding and padded action lanes.
    return out[:B, :action_dim]


def init_params(key, state_dim, action_dim, hidden=100):
    """torch.nn.Linear-style init (uniform +/- 1/sqrt(fan_in)); weights (in, out)."""
    ks = jax.random.split(key, 6)

    def linear(kw, kb, fan_in, fan_out):
        bound = 1.0 / jnp.sqrt(jnp.float32(fan_in))
        w = jax.random.uniform(kw, (fan_in, fan_out), jnp.float32, -bound, bound)
        b = jax.random.uniform(kb, (1, fan_out), jnp.float32, -bound, bound)
        return w, b

    w1, b1 = linear(ks[0], ks[1], state_dim, hidden)
    w2, b2 = linear(ks[2], ks[3], hidden, hidden)
    w3, b3 = linear(ks[4], ks[5], hidden, action_dim)
    return (w1, b1, w2, b2, w3, b3)


def reference_forward(state, params):
    w1, b1, w2, b2, w3, b3 = params
    h = jax.nn.leaky_relu(state @ w1 + b1, NEG_SLOPE)
    h = jax.nn.leaky_relu(h @ w2 + b2, NEG_SLOPE)
    return jax.nn.softmax(h @ w3 + b3, axis=1)


if __name__ == "__main__":
    key = jax.random.PRNGKey(0)
    k_params, k_state = jax.random.split(key)

    batch, state_dim, action_dim, hidden = 8, 16, 6, 100
    params = init_params(k_params, state_dim, action_dim, hidden)
    state = jax.random.normal(k_state, (batch, state_dim), jnp.float32)

    padded_params = pad_params(params)  # done once; reused across calls
    out = policy_forward(state, padded_params, action_dim)
    out = jax.block_until_ready(out)

    ref = reference_forward(state, params)
    assert out.shape == (batch, action_dim)
    assert jnp.allclose(jnp.sum(out, axis=1), 1.0, atol=1e-4)
    assert jnp.allclose(out, ref, atol=1e-4, rtol=1e-4)

    print("KERNEL_OK")
</pallas_src>

<mosaic_0001>
module attributes {stable_mosaic.version = 11 : i64} {
  func.func @policy_kernel(%arg0: i32, %arg1: memref<8x16xf32, #tpu.memory_space<vmem>>, %arg2: memref<16x128xf32, #tpu.memory_space<vmem>>, %arg3: memref<1x128xf32, #tpu.memory_space<vmem>>, %arg4: memref<128x128xf32, #tpu.memory_space<vmem>>, %arg5: memref<1x128xf32, #tpu.memory_space<vmem>>, %arg6: memref<128x128xf32, #tpu.memory_space<vmem>>, %arg7: memref<1x128xf32, #tpu.memory_space<vmem>>, %arg8: memref<8x128xf32, #tpu.memory_space<vmem>>) attributes {dimension_semantics = [#tpu.dimension_semantics<parallel>], iteration_bounds = array<i64: 1>, scalar_prefetch = 0 : i64, scratch_operands = 0 : i64, tpu.core_type = #tpu.core_type<tc>, window_params = [{transform_indices = @transform_0, window_bounds = array<i64: 8, 16>}, {pipeline_mode = #tpu.pipeline_mode<synchronous>, transform_indices = @transform_1, window_bounds = array<i64: 16, 128>}, {pipeline_mode = #tpu.pipeline_mode<synchronous>, transform_indices = @transform_2, window_bounds = array<i64: 1, 128>}, {pipeline_mode = #tpu.pipeline_mode<synchronous>, transform_indices = @transform_3, window_bounds = array<i64: 128, 128>}, {pipeline_mode = #tpu.pipeline_mode<synchronous>, transform_indices = @transform_4, window_bounds = array<i64: 1, 128>}, {pipeline_mode = #tpu.pipeline_mode<synchronous>, transform_indices = @transform_5, window_bounds = array<i64: 128, 128>}, {pipeline_mode = #tpu.pipeline_mode<synchronous>, transform_indices = @transform_6, window_bounds = array<i64: 1, 128>}, {transform_indices = @transform_7, window_bounds = array<i64: 8, 128>}]} {
    %c0 = arith.constant 0 : index
    %c0_0 = arith.constant 0 : index
    %0 = vector.load %arg1[%c0, %c0_0] : memref<8x16xf32, #tpu.memory_space<vmem>>, vector<8x16xf32>
    %c0_1 = arith.constant 0 : index
    %c0_2 = arith.constant 0 : index
    %1 = vector.load %arg2[%c0_1, %c0_2] : memref<16x128xf32, #tpu.memory_space<vmem>>, vector<16x128xf32>
    %cst = arith.constant dense<0.000000e+00> : vector<8x128xf32>
    %2 = tpu.matmul %0, %1, %cst {dimension_numbers = #tpu.dot_dimension_numbers<[1], [0], [0], [1], [0, 0, 1, 1], [], []>} : vector<8x16xf32>, vector<16x128xf32>, vector<8x128xf32> -> vector<8x128xf32>
    %c0_3 = arith.constant 0 : index
    %c0_4 = arith.constant 0 : index
    %3 = vector.load %arg3[%c0_3, %c0_4] : memref<1x128xf32, #tpu.memory_space<vmem>>, vector<1x128xf32>
    %4 = vector.broadcast %3 : vector<1x128xf32> to vector<8x128xf32>
    %5 = arith.addf %2, %4 : vector<8x128xf32>
    %cst_5 = arith.constant 0.000000e+00 : f32
    %6 = vector.broadcast %cst_5 : f32 to vector<8x128xf32>
    %7 = arith.cmpf ogt, %5, %6 : vector<8x128xf32>
    %cst_6 = arith.constant 0.00999999977 : f32
    %8 = vector.broadcast %cst_6 : f32 to vector<8x128xf32>
    %9 = arith.mulf %8, %5 : vector<8x128xf32>
    %10 = arith.select %7, %5, %9 : vector<8x128xi1>, vector<8x128xf32>
    %c0_7 = arith.constant 0 : index
    %c0_8 = arith.constant 0 : index
    %11 = vector.load %arg4[%c0_7, %c0_8] : memref<128x128xf32, #tpu.memory_space<vmem>>, vector<128x128xf32>
    %cst_9 = arith.constant dense<0.000000e+00> : vector<8x128xf32>
    %12 = tpu.matmul %10, %11, %cst_9 {dimension_numbers = #tpu.dot_dimension_numbers<[1], [0], [0], [1], [0, 0, 1, 1], [], []>} : vector<8x128xf32>, vector<128x128xf32>, vector<8x128xf32> -> vector<8x128xf32>
    %c0_10 = arith.constant 0 : index
    %c0_11 = arith.constant 0 : index
    %13 = vector.load %arg5[%c0_10, %c0_11] : memref<1x128xf32, #tpu.memory_space<vmem>>, vector<1x128xf32>
    %14 = vector.broadcast %13 : vector<1x128xf32> to vector<8x128xf32>
    %15 = arith.addf %12, %14 : vector<8x128xf32>
    %cst_12 = arith.constant 0.000000e+00 : f32
    %16 = vector.broadcast %cst_12 : f32 to vector<8x128xf32>
    %17 = arith.cmpf ogt, %15, %16 : vector<8x128xf32>
    %cst_13 = arith.constant 0.00999999977 : f32
    %18 = vector.broadcast %cst_13 : f32 to vector<8x128xf32>
    %19 = arith.mulf %18, %15 : vector<8x128xf32>
    %20 = arith.select %17, %15, %19 : vector<8x128xi1>, vector<8x128xf32>
    %c0_14 = arith.constant 0 : index
    %c0_15 = arith.constant 0 : index
    %21 = vector.load %arg6[%c0_14, %c0_15] : memref<128x128xf32, #tpu.memory_space<vmem>>, vector<128x128xf32>
    %cst_16 = arith.constant dense<0.000000e+00> : vector<8x128xf32>
    %22 = tpu.matmul %20, %21, %cst_16 {dimension_numbers = #tpu.dot_dimension_numbers<[1], [0], [0], [1], [0, 0, 1, 1], [], []>} : vector<8x128xf32>, vector<128x128xf32>, vector<8x128xf32> -> vector<8x128xf32>
    %c0_17 = arith.constant 0 : index
    %c0_18 = arith.constant 0 : index
    %23 = vector.load %arg7[%c0_17, %c0_18] : memref<1x128xf32, #tpu.memory_space<vmem>>, vector<1x128xf32>
    %24 = vector.broadcast %23 : vector<1x128xf32> to vector<8x128xf32>
    %25 = arith.addf %22, %24 : vector<8x128xf32>
    %cst_19 = arith.constant dense<0xFF800000> : vector<8xf32>
    %26 = vector.multi_reduction <maximumf>, %25, %cst_19 [1] : vector<8x128xf32> to vector<8xf32>
    %27 = vector.shape_cast %26 : vector<8xf32> to vector<8x1xf32>
    %28 = vector.broadcast %27 : vector<8x1xf32> to vector<8x128xf32>
    %29 = arith.subf %25, %28 : vector<8x128xf32>
    %30 = math.exp %29 : vector<8x128xf32>
    %cst_20 = arith.constant dense<0.000000e+00> : vector<8xf32>
    %31 = vector.multi_reduction <add>, %30, %cst_20 [1] : vector<8x128xf32> to vector<8xf32>
    %32 = vector.shape_cast %31 : vector<8xf32> to vector<8x1xf32>
    %33 = tpu.reciprocal %32 {approx = true} : vector<8x1xf32> -> vector<8x1xf32>
    %34 = arith.mulf %32, %33 : vector<8x1xf32>
    %cst_21 = arith.constant 2.000000e+00 : f32
    %35 = vector.broadcast %cst_21 : f32 to vector<8x1xf32>
    %36 = arith.subf %35, %34 : vector<8x1xf32>
    %37 = arith.mulf %33, %36 : vector<8x1xf32>
    %38 = vector.broadcast %37 : vector<8x1xf32> to vector<8x128xf32>
    %39 = arith.mulf %30, %38 : vector<8x128xf32>
    %c0_22 = arith.constant 0 : index
    %c0_23 = arith.constant 0 : index
    %40 = vector.load %arg8[%c0_22, %c0_23] : memref<8x128xf32, #tpu.memory_space<vmem>>, vector<8x128xf32>
    tpu.vector_store %arg8[%c0_22, %c0_23], %39 {strides = array<i32>} : memref<8x128xf32, #tpu.memory_space<vmem>>, vector<8x128xf32>,
    return
  }
  func.func @transform_0(%arg0: i32) -> (i32, i32) {
    %c0_i32 = arith.constant 0 : i32
    %c0_i32_0 = arith.constant 0 : i32
    return %arg0, %c0_i32 : i32, i32
  }
  func.func @transform_1(%arg0: i32) -> (i32, i32) {
    %c0_i32 = arith.constant 0 : i32
    %c0_i32_0 = arith.constant 0 : i32
    %c0_i32_1 = arith.constant 0 : i32
    return %c0_i32, %c0_i32_0 : i32, i32
  }
  func.func @transform_2(%arg0: i32) -> (i32, i32) {
    %c0_i32 = arith.constant 0 : i32
    %c0_i32_0 = arith.constant 0 : i32
    %c0_i32_1 = arith.constant 0 : i32
    return %c0_i32, %c0_i32_0 : i32, i32
  }
  func.func @transform_3(%arg0: i32) -> (i32, i32) {
    %c0_i32 = arith.constant 0 : i32
    %c0_i32_0 = arith.constant 0 : i32
    %c0_i32_1 = arith.constant 0 : i32
    return %c0_i32, %c0_i32_0 : i32, i32
  }
  func.func @transform_4(%arg0: i32) -> (i32, i32) {
    %c0_i32 = arith.constant 0 : i32
    %c0_i32_0 = arith.constant 0 : i32
    %c0_i32_1 = arith.constant 0 : i32
    return %c0_i32, %c0_i32_0 : i32, i32
  }
  func.func @transform_5(%arg0: i32) -> (i32, i32) {
    %c0_i32 = arith.constant 0 : i32
    %c0_i32_0 = arith.constant 0 : i32
    %c0_i32_1 = arith.constant 0 : i32
    return %c0_i32, %c0_i32_0 : i32, i32
  }
  func.func @transform_6(%arg0: i32) -> (i32, i32) {
    %c0_i32 = arith.constant 0 : i32
    %c0_i32_0 = arith.constant 0 : i32
    %c0_i32_1 = arith.constant 0 : i32
    return %c0_i32, %c0_i32_0 : i32, i32
  }
  func.func @transform_7(%arg0: i32) -> (i32, i32) {
    %c0_i32 = arith.constant 0 : i32
    %c0_i32_0 = arith.constant 0 : i32
    return %arg0, %c0_i32 : i32, i32
  }
}

</mosaic_0001>

<bundles_post_ra>
// kernel: tpu_custom_call.1
= control target key start
LH: loop header
LB: loop body
LE: loop exit
PB: predicated region body
PF: predicated region fallthrough
CT: control target
= control target key end

     0   :  { %12 = vsyncpa [#allocation3], 0  ;;  %s747_s0 = inlined_call_operand.hbm [shape: f32[8,16], index: 0, kind: input, shape index: {}]   ;;  %s748_s1 = inlined_call_operand.hbm [shape: f32[16,128], index: 1, kind: input, shape index: {}]   ;;  %s749_s2 = inlined_call_operand.vmem [shape: f32[1,128], index: 2, kind: input, shape index: {}]   ;;  %s750_s3 = inlined_call_operand.hbm [shape: f32[128,128], index: 3, kind: input, shape index: {}]   ;;  %s751_s4 = inlined_call_operand.vmem [shape: f32[1,128], index: 4, kind: input, shape index: {}]   ;;  %s752_s5 = inlined_call_operand.hbm [shape: f32[128,128], index: 5, kind: input, shape index: {}]   ;;  %s753_s6 = inlined_call_operand.vmem [shape: f32[1,128], index: 6, kind: input, shape index: {}]   ;;  %s754_s7 = inlined_call_operand.hbm [shape: f32[8,128], index: 7, kind: output, shape index: {}]  }
   0x1   :  { %13 = vsyncpa [#allocation6], 0 }
   0x2   :  { %14 = vsyncpa [#allocation9], 0 }
   0x3   :  { %15 = vsyncpa [#allocation4], 0  ;;  %s625_s24 = smov [#allocation5]  }
   0x4   :  { %s31_s25 = sshll.u32 %s625_s24, 4  ;;  %s32_s25 = int_to_ptr.vmem [resolvable:$true] %s31_s25 }
   0x5   :  { %s525_s26 = scalar_lea.vmem %s32_s25, 256  ;;  %p530_p1 = scmp.lt.s32.totalorder %s32_s25, %s32_s25 }
   0x6   :  { %p526_p0 = scmp.ne.s32.totalorder %s32_s25, %s525_s26  ;;  %p531_p2 = scmp.lt.s32.totalorder %s525_s26, %s525_s26 }
   0x8   :  { %p532_p3 = por %p531_p2, %p530_p1 }
   0xa   :  { %p533_p4 = pnand %p532_p3, %p526_p0 }
   0xc   :  { %536 = shalt.err (!%p533_p4)
}
   0xd   :  { %s626_s27 = smov 128   ;;  %s627_s28 = smov 8  }
   0xe   :  { %37 = dma.hbm_to_vmem [thread:$0]  %s748_s1, 256, %s32_s25, [#allocation6], %s626_s27, %s626_s27, %s627_s28  }
   0xf   :  { %s628_s8 = smov [#allocation2]   ;;  %s629_s10 = smov [#allocation7]  }
  0x10   :  { %s22_s9 = sshll.u32 %s628_s8, 4  ;;  %s45_s11 = sshll.u32 %s629_s10, 4  ;;  %s23_s9 = int_to_ptr.vmem [resolvable:$true] %s22_s9  ;;  %s46_s11 = int_to_ptr.vmem [resolvable:$true] %s45_s11 }
  0x11   :  { %s545_s12 = scalar_lea.vmem %s23_s9, 128  ;;  %p550_p6 = scmp.lt.s32.totalorder %s23_s9, %s23_s9 }
  0x12   :  { %p546_p5 = scmp.ne.s32.totalorder %s23_s9, %s545_s12  ;;  %p551_p7 = scmp.lt.s32.totalorder %s545_s12, %s545_s12 }
  0x14   :  { %p552_p8 = por %p551_p7, %p550_p6 }
  0x16   :  { %p553_p9 = pnand %p552_p8, %p546_p5 }
  0x18   :  { %556 = shalt.err (!%p553_p9)
}
  0x19   :  { %25 = dma.hbm_to_vmem [thread:$0]  %s747_s0, 128, %s23_s9, [#allocation3]  }
  0x1a   :  { %s565_s15 = scalar_lea.vmem %s46_s11, 2048  ;;  %p570_p11 = scmp.lt.s32.totalorder %s46_s11, %s46_s11 }
  0x1b   :  { %p566_p10 = scmp.ne.s32.totalorder %s46_s11, %s565_s15  ;;  %p571_p12 = scmp.lt.s32.totalorder %s565_s15, %s565_s15 }
  0x1d   :  { %p572_p13 = por %p571_p12, %p570_p11 }
  0x1f   :  { %p573_p0 = pnand %p572_p13, %p566_p10 }
  0x21   :  { %576 = shalt.err (!%p573_p0)
}
  0x22   :  { %51 = dma.hbm_to_vmem [thread:$0]  %s750_s3, 2048, %s46_s11, [#allocation6], %s626_s27, %s626_s27, %s627_s28  }
  0x23   :  { %s630_s17 = smov [#allocation8]  }
  0x24   :  { %s59_s18 = sshll.u32 %s630_s17, 4  ;;  %s60_s18 = int_to_ptr.vmem [resolvable:$true] %s59_s18 }
  0x25   :  { %s585_s19 = scalar_lea.vmem %s60_s18, 2048  ;;  %p590_p2 = scmp.lt.s32.totalorder %s60_s18, %s60_s18 }
  0x26   :  { %p586_p1 = scmp.ne.s32.totalorder %s60_s18, %s585_s19  ;;  %p591_p3 = scmp.lt.s32.totalorder %s585_s19, %s585_s19 }
  0x28   :  { %p592_p4 = por %p591_p3, %p590_p2 }
  0x2a   :  { %p593_p5 = pnand %p592_p4, %p586_p1 }
  0x2c   :  { %596 = shalt.err (!%p593_p5)
}
  0x2d   :  { %65 = dma.hbm_to_vmem [thread:$0]  %s752_s5, 2048, %s60_s18, [#allocation9], %s626_s27, %s626_s27, %s627_s28  }
  0x2e   :  { %617 = dma.done.wait [#allocation3], 128  }
  0x2f   :  { %618 = vsyncadd [#allocation3], 4294967168 }
  0x30   :  { %619 = dma.done.wait [#allocation6], 2304  }
  0x31   :  { %620 = vsyncadd [#allocation6], 4294964992 }
  0x32   :  { %621 = dma.done.wait [#allocation9], 2048  }
  0x33   :  { %622 = vsyncadd [#allocation9], 4294965248  ;;  %v631_v0 = vmov 0.0   ;;  %vm632_vm0 = vmmov 0   ;;  %v82_v1 = vld [vmem:[#allocation5 + $0x8] sm:$0xff]  ;;  %v81_v2 = vld [vmem:[#allocation5] sm:$0xff] }
  0x34   :  { %427 = vmatprep.subr.mxu0 %v631_v0  ;;  %431 = vmatprep.mubr.msk.f32.mxu0 %vm632_vm0, %v631_v0  ;;  %v80_v3 = vld [vmem:[#allocation2] sm:$0xff]  ;;  %vm90_vm1 = vcmask 130048   ;;  %v182_v4 = vld [vmem:[#allocation7 + $0x78] sm:$0xff]  ;;  %v181_v5 = vld [vmem:[#allocation7 + $0x70] sm:$0xff] }
  0x35   :  { %434 = vmatprep.subr.mxu1 %v631_v0  ;;  %466 = vmatprep.mubr.msk.f32.mxu1 %vm632_vm0, %v631_v0  ;;  %v180_v6 = vld [vmem:[#allocation7 + $0x68] sm:$0xff]  ;;  %v179_v7 = vld [vmem:[#allocation7 + $0x60] sm:$0xff]  ;;  %v178_v8 = vld [vmem:[#allocation7 + $0x58] sm:$0xff] }
  0x36   :  { %428 = vmatpush3.msra.mxu0 %v82_v1  ;;  %435 = vmatpush3.msra.mxu1 %v182_v4  ;;  %v177_v9 = vld [vmem:[#allocation7 + $0x50] sm:$0xff]  ;;  %v176_v10 = vld [vmem:[#allocation7 + $0x48] sm:$0xff]  ;;  %v175_v11 = vld [vmem:[#allocation7 + $0x40] sm:$0xff] }
  0x37   :  { %429 = vmatprep.subr.mxu0 %v631_v0  ;;  %436 = vmatprep.subr.mxu1 %v631_v0  ;;  %v174_v12 = vld [vmem:[#allocation7 + $0x38] sm:$0xff]  ;;  %v173_v13 = vld [vmem:[#allocation7 + $0x30] sm:$0xff]  ;;  %v172_v14 = vld [vmem:[#allocation7 + $0x28] sm:$0xff] }
  0x38   :  { %430 = vmatpush3.msra.mxu0 %v81_v2  ;;  %437 = vmatpush3.msra.mxu1 %v181_v5  ;;  %v171_v15 = vld [vmem:[#allocation7 + $0x20] sm:$0xff]  ;;  %v170_v16 = vld [vmem:[#allocation7 + $0x18] sm:$0xff]  ;;  %v169_v17 = vld [vmem:[#allocation7 + $0x10] sm:$0xff] }
  0x39   :  { %432 = vmatmul.mubr.msk.f32.vlgmr.msra.gmra.mxu0 %vm90_vm1, %v80_v3  ;;  %438 = vmatprep.subr.mxu1 %v631_v0  ;;  %v168_v18 = vld [vmem:[#allocation7 + $0x8] sm:$0xff]  ;;  %v167_v19 = vld [vmem:[#allocation7] sm:$0xff]  ;;  %v278_v20 = vld [vmem:[#allocation8 + $0x78] sm:$0xff] }
  0x3a   :  { %469 = vmatprep.subr.mxu0 %v631_v0  ;;  %439 = vmatpush3.msra.mxu1 %v180_v6  ;;  %v277_v21 = vld [vmem:[#allocation8 + $0x70] sm:$0xff]  ;;  %v276_v22 = vld [vmem:[#allocation8 + $0x68] sm:$0xff]  ;;  %v275_v23 = vld [vmem:[#allocation8 + $0x60] sm:$0xff] }
  0x3b   :  { %501 = vmatprep.mubr.msk.f32.mxu0 %vm632_vm0, %v631_v0  ;;  %440 = vmatprep.subr.mxu1 %v631_v0  ;;  %v274_v24 = vld [vmem:[#allocation8 + $0x58] sm:$0xff]  ;;  %v273_v25 = vld [vmem:[#allocation8 + $0x50] sm:$0xff]  ;;  %v272_v26 = vld [vmem:[#allocation8 + $0x48] sm:$0xff] }
  0x3c   :  { %441 = vmatpush3.msra.mxu1 %v179_v7  ;;  %470 = vmatpush3.msra.mxu0 %v278_v20  ;;  %v271_v27 = vld [vmem:[#allocation8 + $0x40] sm:$0xff]  ;;  %v270_v28 = vld [vmem:[#allocation8 + $0x38] sm:$0xff]  ;;  %v269_v29 = vld [vmem:[#allocation8 + $0x30] sm:$0xff] }
  0x3d   :  { %442 = vmatprep.subr.mxu1 %v631_v0  ;;  %471 = vmatprep.subr.mxu0 %v631_v0  ;;  %v268_v30 = vld [vmem:[#allocation8 + $0x28] sm:$0xff]  ;;  %v267_v31 = vld [vmem:[#allocation8 + $0x20] sm:$0xff]  ;;  %v266_v32 = vld [vmem:[#allocation8 + $0x18] sm:$0xff] }
  0x3e   :  { %443 = vmatpush3.msra.mxu1 %v178_v8  ;;  %472 = vmatpush3.msra.mxu0 %v277_v21  ;;  %v386_v33 = vld [vmem:[%s749_s2] ss:$0 sm:$0xff]  ;;  %v265_v39 = vld [vmem:[#allocation8 + $0x10] sm:$0xff]  ;;  %v263_v41 = vld [vmem:[#allocation8] sm:$0xff] }
  0x3f   :  { %444 = vmatprep.subr.mxu1 %v631_v0  ;;  %473 = vmatprep.subr.mxu0 %v631_v0  ;;  %v264_v40 = vld [vmem:[#allocation8 + $0x8] sm:$0xff] }
  0x40   :  { %445 = vmatpush3.msra.mxu1 %v177_v9  ;;  %474 = vmatpush3.msra.mxu0 %v276_v22  ;;  %v388_v42 = vld [vmem:[%s751_s4] ss:$0 sm:$0xff]  ;;  %s633_s4 = smov [#allocation10]  }
  0x41   :  { %446 = vmatprep.subr.mxu1 %v631_v0  ;;  %475 = vmatprep.subr.mxu0 %v631_v0  ;;  %v389_v48 = vld [vmem:[%s753_s6] ss:$0 sm:$0xff]  ;;  %s375_s24 = sshll.u32 %s633_s4, 4  ;;  %s376_s24 = int_to_ptr.vmem [resolvable:$true] %s375_s24 }
  0x42   :  { %447 = vmatpush3.msra.mxu1 %v176_v10  ;;  %476 = vmatpush3.msra.mxu0 %v275_v23  ;;  %s597_s6 = scalar_lea.vmem %s376_s24, 128  ;;  %p602_p7 = scmp.lt.s32.totalorder %s376_s24, %s376_s24 }
  0x43   :  { %448 = vmatprep.subr.mxu1 %v631_v0  ;;  %477 = vmatprep.subr.mxu0 %v631_v0  ;;  %p598_p6 = scmp.ne.s32.totalorder %s376_s24, %s597_s6  ;;  %p603_p8 = scmp.lt.s32.totalorder %s597_s6, %s597_s6 }
  0x44   :  { %449 = vmatpush3.msra.mxu1 %v175_v11  ;;  %478 = vmatpush3.msra.mxu0 %v274_v24 }
  0x45   :  { %450 = vmatprep.subr.mxu1 %v631_v0  ;;  %479 = vmatprep.subr.mxu0 %v631_v0  ;;  %p604_p9 = por %p603_p8, %p602_p7 }
  0x46   :  { %451 = vmatpush3.msra.mxu1 %v174_v12  ;;  %480 = vmatpush3.msra.mxu0 %v273_v25 }
  0x47   :  { %452 = vmatprep.subr.mxu1 %v631_v0  ;;  %481 = vmatprep.subr.mxu0 %v631_v0  ;;  %p605_p10 = pnand %p604_p9, %p598_p6 }
  0x48   :  { %453 = vmatpush3.msra.mxu1 %v173_v13  ;;  %482 = vmatpush3.msra.mxu0 %v272_v26 }
  0x49   :  { %454 = vmatprep.subr.mxu1 %v631_v0  ;;  %483 = vmatprep.subr.mxu0 %v631_v0 }
  0x4a   :  { %455 = vmatpush3.msra.mxu1 %v172_v14  ;;  %484 = vmatpush3.msra.mxu0 %v271_v27 }
  0x4b   :  { %456 = vmatprep.subr.mxu1 %v631_v0  ;;  %485 = vmatprep.subr.mxu0 %v631_v0 }
  0x4c   :  { %457 = vmatpush3.msra.mxu1 %v171_v15  ;;  %486 = vmatpush3.msra.mxu0 %v270_v28 }
  0x4d   :  { %458 = vmatprep.subr.mxu1 %v631_v0  ;;  %487 = vmatprep.subr.mxu0 %v631_v0 }
  0x4e   :  { %459 = vmatpush3.msra.mxu1 %v170_v16  ;;  %488 = vmatpush3.msra.mxu0 %v269_v29 }
  0x4f   :  { %460 = vmatprep.subr.mxu1 %v631_v0  ;;  %489 = vmatprep.subr.mxu0 %v631_v0 }
  0x50   :  { %461 = vmatpush3.msra.mxu1 %v169_v17  ;;  %490 = vmatpush3.msra.mxu0 %v268_v30 }
  0x51   :  { %462 = vmatprep.subr.mxu1 %v631_v0  ;;  %491 = vmatprep.subr.mxu0 %v631_v0 }
  0x52   :  { %463 = vmatpush3.msra.mxu1 %v168_v18  ;;  %492 = vmatpush3.msra.mxu0 %v267_v31 }
  0x53   :  { %464 = vmatprep.subr.mxu1 %v631_v0  ;;  %493 = vmatprep.subr.mxu0 %v631_v0 }
  0x54   :  { %465 = vmatpush3.msra.mxu1 %v167_v19  ;;  %494 = vmatpush3.msra.mxu0 %v266_v32 }
  0x55   :  { %495 = vmatprep.subr.mxu0 %v631_v0 }
  0x56   :  { %496 = vmatpush3.msra.mxu0 %v265_v39 }
  0x57   :  { %497 = vmatprep.subr.mxu0 %v631_v0 }
  0x58   :  { %498 = vmatpush3.msra.mxu0 %v264_v40 }
  0x59   :  { %499 = vmatprep.subr.mxu0 %v631_v0 }
  0x5a   :  { %500 = vmatpush3.msra.mxu0 %v263_v41 }
  0xf9   :  { %v160_v34 = vpop.f32.mrf.mxu0 }
  0xfa   :  { %v161_v35 = vadd.f32 %v386_v33, %v160_v34 }
  0xfb   :  { %v433_v36 = vpop.f32.mrf.mxu0 }
  0xfc   :  { %v165_v37 = vmul.f32 0.01, %v161_v35  ;;  %vm164_vm2 = vcmp.gt.f32.partialorder %v161_v35, 0.0 }
  0xfe   :  { %v166_v38 = vsel %vm164_vm2, %v161_v35, %v165_v37 }
  0xff   :  { %467 = vmatmul.mubr.f32.vlgmr.msra.gmra.mxu1 %v166_v38 }
 0x1bf   :  { %v256_v43 = vpop.f32.mrf.mxu1 }
 0x1c0   :  { %v257_v44 = vadd.f32 %v388_v42, %v256_v43 }
 0x1c1   :  { %v468_v45 = vpop.f32.mrf.mxu1 }
 0x1c2   :  { %vm260_vm3 = vcmp.gt.f32.partialorder %v257_v44, 0.0  ;;  %v261_v46 = vmul.f32 0.01, %v257_v44 }
 0x1c4   :  { %v262_v47 = vsel %vm260_vm3, %v257_v44, %v261_v46 }
 0x1c5   :  { %502 = vmatmul.mubr.f32.vlgmr.msra.gmra.mxu0 %v262_v47 }
 0x285   :  { %v352_v49 = vpop.f32.mrf.mxu0 }
 0x286   :  { %v353_v50 = vadd.f32 %v389_v48, %v352_v49 }
 0x287   :  { %v503_v51 = vpop.f32.mrf.mxu0 }
 0x288   :  { %356 = vmax.xlane.f32.xlu0 %v353_v50 }
 0x311   :  { %v357_v52 = vpop.xlane.xlu0 %356 }
 0x312   :  { %v358_v53 = vsub.f32 %v353_v50, %v357_v52 }
 0x314   :  { %v359_v54 = vmul.f32 1.442695, %v358_v53 }
 0x316   :  { %513 = vpow2.f32 %v359_v54 }
 0x323   :  { %v514_v55 = vpop.eup %513 }
 0x324   :  { %361 = vadd.xlane.f32.xlu0 %v514_v55 }
 0x3ad   :  { %v362_v56 = vpop.xlane.xlu0 %361 }
 0x3ae   :  { %515 = vrcp.f32 %v362_v56 }
 0x3bb   :  { %v516_v57 = vpop.eup %515 }
 0x3bc   :  { %v364_v58 = vmul.f32 %v516_v57, %v362_v56 }
 0x3be   :  { %v365_v59 = vsub.f32 2.0, %v364_v58 }
 0x3c0   :  { %v366_v60 = vmul.f32 %v516_v57, %v365_v59 }
 0x3c2   :  { %v367_v61 = vmul.f32 %v514_v55, %v366_v60 }
 0x3c4   :  { %368 = vst [vmem:[#allocation10] sm:$0xff] %v367_v61 }
 0x3c5   :  { %608 = shalt.err (!%p605_p10)
}
 0x3c6   :  { %378 = dma.vmem_to_hbm [thread:$0]  %s376_s24, 128, %s754_s7, [#allocation4]  }
 0x3c7   :  { %623 = dma.done.wait [#allocation4], 128  }
 0x3c8   :  { %624 = vsyncadd [#allocation4], 4294967168 }
 0x3c9   :  { %382 = vsyncpa [#allocation3], 1 }
 0x3ca   :  { %383 = vsyncpa [#allocation6], 1 }
 0x3cb   :  { %384 = vsyncpa [#allocation9], 1 }
 0x3cc   :  { %385 = vsyncpa [#allocation4], 1 }

</bundles_post_ra>
